<compile_context>
chip_gen: v7x
topology: tpu7x:2x2x1
jax: 0.10.0
libtpu: 0.0.40
codegen_flags: <defaults>
</compile_context>

<pallas_src>
import functools

import jax
import jax.numpy as jnp
from jax.experimental import pallas as pl
from jax.experimental.pallas import tpu as pltpu


_BN_EPS = 1e-5
_EXPANSION = 4

_VMEM_SPEC = pl.BlockSpec(memory_space=pltpu.MemorySpace.VMEM)


def _round_up(x, m):
    return (x + m - 1) // m * m


def _pick_tile(dim, candidates):
    """Largest preferred tile that evenly divides `dim`, else the full dim (legal full block)."""
    for c in candidates:
        if dim >= c and dim % c == 0:
            return c
    return dim


def _pick_tile_m(dim, candidates):
    """Like _pick_tile but prefers >=2 tiles so both v7x TensorCores get work on 'parallel' M."""
    for c in candidates:
        if dim % c == 0 and dim // c >= 2:
            return c
    return _pick_tile(dim, candidates)


def _vmem_limit_bytes():
    try:
        cap = int(pltpu.get_tpu_info().vmem_capacity_bytes)
        return (cap * 3) // 4          # 96 MiB on 128 MiB parts (v5e/v6e), 48 MiB on v7x.
    except Exception:
        return None


_VMEM_LIMIT = _vmem_limit_bytes()


def _compiler_params(dims=None):
    kwargs = {}
    if dims is not None:
        kwargs["dimension_semantics"] = dims
    if _VMEM_LIMIT is not None:
        kwargs["vmem_limit_bytes"] = _VMEM_LIMIT
    return pltpu.CompilerParams(**kwargs)


# --------------------------------------------------------------------------------------
# Pallas kernels
# --------------------------------------------------------------------------------------

def _matmul_stats_kernel(a_ref, b_ref, o_ref, stats_ref, acc_ref):
    """bf16 x bf16 tiled matmul accumulating into a f32 VMEM scratch; at k==last emit the
    bf16 output tile plus per-tile channel sum / sum-of-squares (rows 0 / 1 of stats)."""
    k = pl.program_id(2)

    @pl.when(k == 0)
    def _():
        acc_ref[...] = jnp.zeros_like(acc_ref)
        stats_ref[...] = jnp.zeros_like(stats_ref)

    acc_ref[...] += jnp.dot(a_ref[...], b_ref[...], preferred_element_type=jnp.float32)

    @pl.when(k == pl.num_programs(2) - 1)
    def _():
        acc = acc_ref[...]
        o_ref[...] = acc.astype(o_ref.dtype)
        stats_ref[0:1, :] = jnp.sum(acc, axis=0, keepdims=True)
        stats_ref[1:2, :] = jnp.sum(acc * acc, axis=0, keepdims=True)


def matmul_stats_pallas(a, b):
    """a: (M, K) bf16, b: (K, N) bf16 -> (y (M, N) bf16, per-channel sum (N,), sumsq (N,))."""
    M, K = a.shape
    _, N = b.shape

    tm = _pick_tile_m(M, (512, 256, 128))
    tn = N if N <= 1024 else _pick_tile(N, (512, 256, 128))
    # No host-side zero-pad of K: a full-extent K block is legal when K % 128 != 0.
    tk = K if (K % 128 != 0) else _pick_tile(K, (1024, 512, 256, 128))
    grid = (M // tm, N // tn, K // tk)

    y, stats = pl.pallas_call(
        _matmul_stats_kernel,
        out_shape=(jax.ShapeDtypeStruct((M, N), jnp.bfloat16),
                   jax.ShapeDtypeStruct((grid[0] * 8, N), jnp.float32)),
        grid_spec=pltpu.PrefetchScalarGridSpec(
            num_scalar_prefetch=0,
            grid=grid,
            in_specs=[pl.BlockSpec((tm, tk), lambda i, j, k: (i, k)),
                      pl.BlockSpec((tk, tn), lambda i, j, k: (k, j))],
            out_specs=(pl.BlockSpec((tm, tn), lambda i, j, k: (i, j)),
                       pl.BlockSpec((8, tn), lambda i, j, k: (i, j))),
            scratch_shapes=[pltpu.VMEM((tm, tn), jnp.float32)]),
        compiler_params=_compiler_params(("parallel", "parallel", "arbitrary")),
    )(a, b)

    st = stats.reshape(grid[0], 8, N)
    col_sum = jnp.sum(st[:, 0, :], axis=0)
    col_sumsq = jnp.sum(st[:, 1, :], axis=0)
    return y, col_sum, col_sumsq


def _bn_apply_kernel(y_ref, s_ref, t_ref, o_ref, *, relu):
    out = y_ref[...].astype(jnp.float32) * s_ref[...] + t_ref[...]
    if relu:
        out = jnp.maximum(out, 0.0)
    o_ref[...] = out.astype(o_ref.dtype)


def _bn_apply_res_kernel(y_ref, r_ref, s_ref, t_ref, o_ref, *, relu):
    out = (y_ref[...].astype(jnp.float32) * s_ref[...] + t_ref[...]
           + r_ref[...].astype(jnp.float32))
    if relu:
        out = jnp.maximum(out, 0.0)
    o_ref[...] = out.astype(o_ref.dtype)


def bn_apply_pallas(y, scale, shift, residual, relu, out_dtype=jnp.bfloat16):
    """y: (M, C) bf16; scale/shift: (C,) f32; residual: optional (M, C); tiled over M and C."""
    M, C = y.shape
    tm = _pick_tile_m(M, (512, 256, 128))
    tc = _pick_tile(C, (512, 256, 128))
    grid = (M // tm, C // tc)

    row_spec = pl.BlockSpec((tm, tc), lambda i, j: (i, j))
    vec_spec = pl.BlockSpec((1, tc), lambda i, j: (0, j))

    if residual is None:
        kern = functools.partial(_bn_apply_kernel, relu=relu)
        in_specs = [row_spec, vec_spec, vec_spec]
        args = (y, scale.reshape(1, C), shift.reshape(1, C))
    else:
        kern = functools.partial(_bn_apply_res_kernel, relu=relu)
        in_specs = [row_spec, row_spec, vec_spec, vec_spec]
        args = (y, residual, scale.reshape(1, C), shift.reshape(1, C))

    return pl.pallas_call(
        kern,
        out_shape=jax.ShapeDtypeStruct((M, C), out_dtype),
        grid_spec=pltpu.PrefetchScalarGridSpec(
            num_scalar_prefetch=0,
            grid=grid,
            in_specs=in_specs,
            out_specs=row_spec),
        compiler_params=_compiler_params(("parallel", "parallel")),
    )(*args)


def _maxpool_kernel(x_ref, o_ref, *, oh, ow):
    # x block: (1, OH+1, 2, OW+1, 2, tc) view of the -inf-padded input; take the 9-tap max
    # of the 3x3 / stride-2 window with static window loads (no tap tensor in HBM).
    def win(i, j):
        gi, pi = (1, 0) if i == 2 else (0, i)
        gj, pj = (1, 0) if j == 2 else (0, j)
        return x_ref[0, gi:gi + oh, pi, gj:gj + ow, pj, :]

    m = win(0, 0)
    for i in range(3):
        for j in range(3):
            if i or j:
                m = jnp.maximum(m, win(i, j))
    o_ref[0] = m


def _avgpool_kernel(x_ref, o_ref):
    # x block: (N, HW, tc) -> mean over spatial (f32 math).
    o_ref[...] = jnp.mean(x_ref[...].astype(jnp.float32), axis=1)


def _fc_softmax_kernel(x_ref, w_ref, b_ref, logits_ref, probas_ref, *, nc):
    logits = jnp.dot(x_ref[...], w_ref[...], preferred_element_type=jnp.float32) + b_ref[...]
    logits_ref[...] = logits
    col = jax.lax.broadcasted_iota(jnp.int32, logits.shape, 1)
    masked = jnp.where(col < nc, logits, -jnp.inf)
    m = jnp.max(masked, axis=1, keepdims=True)
    e = jnp.exp(masked - m)
    probas_ref[...] = e / jnp.sum(e, axis=1, keepdims=True)


# --------------------------------------------------------------------------------------
# Plain-JAX glue (patch extraction, reshapes) around the kernels
# --------------------------------------------------------------------------------------

def _im2col(x, kh, kw, stride, pad):
    """x: (N, H, W, C) NHWC (bf16) -> patches (N*OH*OW, kh*kw*C), plus (N, OH, OW)."""
    n, h, w, c = x.shape
    oh = (h + 2 * pad - kh) // stride + 1
    ow = (w + 2 * pad - kw) // stride + 1
    if kh == 1 and kw == 1 and pad == 0 and stride == 1:
        return x.reshape(n * h * w, c), (n, oh, ow)
    # TODO(synk): implicit im2col (shifted-window LHS blocks / manual DMA over a kh*kw grid
    # axis) to avoid materializing the kh*kw-x patch tensor in HBM for 3x3 / 7x7 convs.
    xp = jnp.pad(x, ((0, 0), (pad, pad), (pad, pad), (0, 0)))
    cols = []
    for i in range(kh):
        for j in range(kw):
            cols.append(xp[:, i:i + stride * oh:stride, j:j + stride * ow:stride, :])
    patches = jnp.stack(cols, axis=3)                       # (N, OH, OW, kh*kw, C)
    return patches.reshape(n * oh * ow, kh * kw * c), (n, oh, ow)


def conv_bn_act(x, w, gamma, beta, stride, pad, residual=None, relu=True):
    """conv2d (no bias) + BatchNorm2d (training-mode batch stats) + optional residual + ReLU.

    x: (N, H, W, Cin) NHWC bf16;  w: (Cout, Cin, KH, KW) torch layout; returns bf16 NHWC.
    """
    cout, cin, kh, kw = w.shape
    patches, (n, oh, ow) = _im2col(x, kh, kw, stride, pad)
    wmat = jnp.transpose(w, (2, 3, 1, 0)).reshape(kh * kw * cin, cout)

    y, col_sum, col_sumsq = matmul_stats_pallas(patches.astype(jnp.bfloat16),
                                                wmat.astype(jnp.bfloat16))

    # TODO(synk): per-tile Welford (count, mean, M2) merge for better-conditioned variance
    # when channel means are large relative to std (E[x^2]-mean^2 can cancel on real data).
    m_rows = jnp.float32(patches.shape[0])
    mean = col_sum / m_rows
    var = jnp.maximum(col_sumsq / m_rows - mean * mean, 0.0)  # biased variance (torch BN train)
    scale = gamma * jax.lax.rsqrt(var + _BN_EPS)
    shift = beta - mean * scale

    res = None if residual is None else residual.reshape(-1, cout)
    out = bn_apply_pallas(y, scale, shift, res, relu)
    return out.reshape(n, oh, ow, cout)


def maxpool_pallas(x):
    """MaxPool2d(kernel_size=3, stride=2, padding=1) in NHWC, 9-tap max taken in-kernel."""
    n, h, w, c = x.shape
    oh = (h + 2 - 3) // 2 + 1
    ow = (w + 2 - 3) // 2 + 1
    hp = 2 * (oh + 1)
    wp = 2 * (ow + 1)
    xp = jnp.pad(x, ((0, 0), (1, hp - h - 1), (1, wp - w - 1), (0, 0)),
                 constant_values=-jnp.inf)
    xr = xp.reshape(n, oh + 1, 2, ow + 1, 2, c)

    tc = _pick_tile(c, (512, 256, 128))
    out = pl.pallas_call(
        functools.partial(_maxpool_kernel, oh=oh, ow=ow),
        out_shape=jax.ShapeDtypeStruct((n, oh, ow, c), x.dtype),
        grid_spec=pltpu.PrefetchScalarGridSpec(
            num_scalar_prefetch=0,
            grid=(n, c // tc),
            in_specs=[pl.BlockSpec((1, oh + 1, 2, ow + 1, 2, tc),
                                   lambda b, j: (b, 0, 0, 0, 0, j))],
            out_specs=pl.BlockSpec((1, oh, ow, tc), lambda b, j: (b, 0, 0, j))),
        compiler_params=_compiler_params(("parallel", "parallel")),
    )(xr)
    return out


def avgpool_pallas(x):
    """AdaptiveAvgPool2d((1,1)) + flatten: NHWC -> (N, C) f32."""
    n, h, w, c = x.shape
    tc = _pick_tile(c, (512, 256, 128))
    out = pl.pallas_call(
        _avgpool_kernel,
        out_shape=jax.ShapeDtypeStruct((n, c), jnp.float32),
        grid_spec=pltpu.PrefetchScalarGridSpec(
            num_scalar_prefetch=0,
            grid=(c // tc,),
            in_specs=[pl.BlockSpec((n, h * w, tc), lambda j: (0, 0, j))],
            out_specs=pl.BlockSpec((n, tc), lambda j: (0, j))),
        compiler_params=_compiler_params(("parallel",)),
    )(x.reshape(n, h * w, c))
    return out


def fc_softmax_pallas(x, fc_w, fc_b):
    """Linear (torch layout: weight (out, in)) + softmax along dim=1; lane-dense (128) output."""
    n, d = x.shape
    nc = fc_w.shape[0]
    ncp = _round_up(max(nc, 128), 128)
    wT = jnp.zeros((d, ncp), jnp.float32).at[:, :nc].set(jnp.transpose(fc_w))
    b = jnp.zeros((1, ncp), jnp.float32).at[:, :nc].set(fc_b.reshape(1, nc))
    kern = functools.partial(_fc_softmax_kernel, nc=nc)
    logits, probas = pl.pallas_call(
        kern,
        out_shape=(jax.ShapeDtypeStruct((n, ncp), jnp.float32),
                   jax.ShapeDtypeStruct((n, ncp), jnp.float32)),
        in_specs=[_VMEM_SPEC, _VMEM_SPEC, _VMEM_SPEC],
        out_specs=(_VMEM_SPEC, _VMEM_SPEC),
        compiler_params=_compiler_params(),
    )(x.astype(jnp.bfloat16), wT.astype(jnp.bfloat16), b)
    return logits[:, :nc], probas[:, :nc]


# --------------------------------------------------------------------------------------
# ResNet (Bottleneck, expansion=4) parameter init + forward
# --------------------------------------------------------------------------------------

def _kaiming_conv(key, shape):
    # kaiming_normal_(mode='fan_out', nonlinearity='relu'); shape = (O, I, KH, KW)
    fan_out = shape[0] * shape[2] * shape[3]
    return jax.random.normal(key, shape, jnp.float32) * jnp.sqrt(2.0 / fan_out)


def init_resnet_params(key, layers, num_classes, grayscale):
    in_dim = 1 if grayscale else 3
    keys = iter(jax.random.split(key, 512))
    params = {
        "conv1_w": _kaiming_conv(next(keys), (64, in_dim, 7, 7)),
        "bn1_g": jnp.ones(64, jnp.float32),
        "bn1_b": jnp.zeros(64, jnp.float32),
    }
    inplanes = 64
    for li, (planes, nblocks, stride0) in enumerate(zip((64, 128, 256, 512), layers, (1, 2, 2, 2))):
        blocks = []
        for bi in range(nblocks):
            s = stride0 if bi == 0 else 1
            need_ds = (s != 1) or (inplanes != planes * _EXPANSION)
            blk = {
                "stride": s,
                "conv1_w": _kaiming_conv(next(keys), (planes, inplanes, 1, 1)),
                "bn1_g": jnp.ones(planes, jnp.float32), "bn1_b": jnp.zeros(planes, jnp.float32),
                "conv2_w": _kaiming_conv(next(keys), (planes, planes, 3, 3)),
                "bn2_g": jnp.ones(planes, jnp.float32), "bn2_b": jnp.zeros(planes, jnp.float32),
                "conv3_w": _kaiming_conv(next(keys), (planes * _EXPANSION, planes, 1, 1)),
                "bn3_g": jnp.ones(planes * _EXPANSION, jnp.float32),
                "bn3_b": jnp.zeros(planes * _EXPANSION, jnp.float32),
                "downsample": ((_kaiming_conv(next(keys), (planes * _EXPANSION, inplanes, 1, 1)),
                                jnp.ones(planes * _EXPANSION, jnp.float32),
                                jnp.zeros(planes * _EXPANSION, jnp.float32))
                               if need_ds else None),
            }
            blocks.append(blk)
            inplanes = planes * _EXPANSION
        params[f"layer{li + 1}"] = blocks
    fan_in = 512 * _EXPANSION
    bound = 1.0 / (fan_in ** 0.5)
    params["fc_w"] = jax.random.uniform(next(keys), (num_classes, fan_in), jnp.float32, -bound, bound)
    params["fc_b"] = jax.random.uniform(next(keys), (num_classes,), jnp.float32, -bound, bound)
    return params


def bottleneck_forward(x, p):
    """Bottleneck: 1x1 -> 3x3(stride) -> 1x1(*4), BN after each, residual add, ReLU."""
    out = conv_bn_act(x, p["conv1_w"], p["bn1_g"], p["bn1_b"], stride=1, pad=0, relu=True)
    out = conv_bn_act(out, p["conv2_w"], p["bn2_g"], p["bn2_b"], stride=p["stride"], pad=1, relu=True)
    if p["downsample"] is not None:
        dw, dg, db = p["downsample"]
        identity = conv_bn_act(x, dw, dg, db, stride=p["stride"], pad=0, relu=False)
    else:
        identity = x
    out = conv_bn_act(out, p["conv3_w"], p["bn3_g"], p["bn3_b"], stride=1, pad=0,
                      residual=identity, relu=True)
    return out


def resnet_forward(x_nchw, params):
    x = jnp.transpose(x_nchw, (0, 2, 3, 1)).astype(jnp.bfloat16)       # NCHW -> NHWC, bf16
    x = conv_bn_act(x, params["conv1_w"], params["bn1_g"], params["bn1_b"],
                    stride=2, pad=3, relu=True)
    x = maxpool_pallas(x)
    for li in range(1, 5):
        for blk in params[f"layer{li}"]:
            x = bottleneck_forward(x, blk)
    feat = avgpool_pallas(x)                                           # (N, 512*expansion) f32
    logits, probas = fc_softmax_pallas(feat, params["fc_w"], params["fc_b"])
    return logits, probas


# --------------------------------------------------------------------------------------

if __name__ == "__main__":
    key = jax.random.PRNGKey(0)
    pkey, xkey = jax.random.split(key)

    # Small instantiation of the same ResNet class: Bottleneck blocks, one per stage.
    # (The reference ResNet-50 config is layers=(3, 4, 6, 3); same code path, just bigger.)
    layers = (1, 1, 1, 1)
    num_classes = 10
    params = init_resnet_params(pkey, layers, num_classes=num_classes, grayscale=True)

    # MNIST-like grayscale input (batch=2, 1 channel, 32x32), PyTorch NCHW convention.
    x = jax.random.normal(xkey, (2, 1, 32, 32), jnp.float32)

    logits, probas = resnet_forward(x, params)
    jax.block_until_ready((logits, probas))

    assert logits.shape == (2, num_classes) and probas.shape == (2, num_classes)
    assert bool(jnp.all(jnp.isfinite(logits)))
    assert bool(jnp.allclose(jnp.sum(probas, axis=1), 1.0, atol=1e-5))
    print("KERNEL_OK")
</pallas_src>

<mosaic_0001>
module attributes {stable_mosaic.version = 11 : i64} {
  func.func @_matmul_stats_kernel(%arg0: i32, %arg1: i32, %arg2: i32, %arg3: memref<256x49xbf16, #tpu.memory_space<vmem>>, %arg4: memref<49x64xbf16, #tpu.memory_space<vmem>>, %arg5: memref<256x64xbf16, #tpu.memory_space<vmem>>, %arg6: memref<8x64xf32, #tpu.memory_space<vmem>>, %arg7: memref<256x64xf32, #tpu.memory_space<vmem>>) attributes {dimension_semantics = [#tpu.dimension_semantics<parallel>, #tpu.dimension_semantics<parallel>, #tpu.dimension_semantics<arbitrary>], iteration_bounds = array<i64: 2, 1, 1>, scalar_prefetch = 0 : i64, scratch_operands = 1 : i64, tpu.core_type = #tpu.core_type<tc>, window_params = [{transform_indices = @transform_0, window_bounds = array<i64: 256, 49>}, {transform_indices = @transform_1, window_bounds = array<i64: 49, 64>}, {transform_indices = @transform_2, window_bounds = array<i64: 256, 64>}, {transform_indices = @transform_3, window_bounds = array<i64: 8, 64>}]} {
    %c0_i32 = arith.constant 0 : i32
    %0 = arith.cmpi eq, %arg2, %c0_i32 : i32
    %1 = arith.extui %0 : i1 to i32
    %c0_i32_0 = arith.constant 0 : i32
    %2 = arith.cmpi ne, %1, %c0_i32_0 : i32
    scf.if %2 {
      %cst_10 = arith.constant 0.000000e+00 : f32
      %12 = vector.broadcast %cst_10 : f32 to vector<256x64xf32>
      %c0_11 = arith.constant 0 : index
      %c0_12 = arith.constant 0 : index
      %13 = vector.load %arg7[%c0_11, %c0_12] : memref<256x64xf32, #tpu.memory_space<vmem>>, vector<256x64xf32>
      tpu.vector_store %arg7[%c0_11, %c0_12], %12 {strides = array<i32>} : memref<256x64xf32, #tpu.memory_space<vmem>>, vector<256x64xf32>,
      %cst_13 = arith.constant 0.000000e+00 : f32
      %14 = vector.broadcast %cst_13 : f32 to vector<8x64xf32>
      %c0_14 = arith.constant 0 : index
      %c0_15 = arith.constant 0 : index
      %15 = vector.load %arg6[%c0_14, %c0_15] : memref<8x64xf32, #tpu.memory_space<vmem>>, vector<8x64xf32>
      tpu.vector_store %arg6[%c0_14, %c0_15], %14 {strides = array<i32>} : memref<8x64xf32, #tpu.memory_space<vmem>>, vector<8x64xf32>,
    } else {
    }
    %c0 = arith.constant 0 : index
    %c0_1 = arith.constant 0 : index
    %3 = vector.load %arg7[%c0, %c0_1] : memref<256x64xf32, #tpu.memory_space<vmem>>, vector<256x64xf32>
    %c0_2 = arith.constant 0 : index
    %c0_3 = arith.constant 0 : index
    %4 = vector.load %arg3[%c0_2, %c0_3] : memref<256x49xbf16, #tpu.memory_space<vmem>>, vector<256x49xbf16>
    %c0_4 = arith.constant 0 : index
    %c0_5 = arith.constant 0 : index
    %5 = vector.load %arg4[%c0_4, %c0_5] : memref<49x64xbf16, #tpu.memory_space<vmem>>, vector<49x64xbf16>
    %cst = arith.constant dense<0.000000e+00> : vector<256x64xf32>
    %6 = tpu.matmul %4, %5, %cst {dimension_numbers = #tpu.dot_dimension_numbers<[1], [0], [0], [1], [0, 0, 1, 1], [], []>} : vector<256x49xbf16>, vector<49x64xbf16>, vector<256x64xf32> -> vector<256x64xf32>
    %7 = arith.addf %3, %6 : vector<256x64xf32>
    %c0_6 = arith.constant 0 : index
    %c0_7 = arith.constant 0 : index
    %8 = vector.load %arg7[%c0_6, %c0_7] : memref<256x64xf32, #tpu.memory_space<vmem>>, vector<256x64xf32>
    tpu.vector_store %arg7[%c0_6, %c0_7], %7 {strides = array<i32>} : memref<256x64xf32, #tpu.memory_space<vmem>>, vector<256x64xf32>,
    %c0_i32_8 = arith.constant 0 : i32
    %9 = arith.cmpi eq, %arg2, %c0_i32_8 : i32
    %10 = arith.extui %9 : i1 to i32
    %c0_i32_9 = arith.constant 0 : i32
    %11 = arith.cmpi ne, %10, %c0_i32_9 : i32
    scf.if %11 {
      %c0_10 = arith.constant 0 : index
      %c0_11 = arith.constant 0 : index
      %12 = vector.load %arg7[%c0_10, %c0_11] : memref<256x64xf32, #tpu.memory_space<vmem>>, vector<256x64xf32>
      %13 = arith.truncf %12 : vector<256x64xf32> to vector<256x64xbf16>
      %c0_12 = arith.constant 0 : index
      %c0_13 = arith.constant 0 : index
      %14 = vector.load %arg5[%c0_12, %c0_13] : memref<256x64xbf16, #tpu.memory_space<vmem>>, vector<256x64xbf16>
      tpu.vector_store %arg5[%c0_12, %c0_13], %13 {strides = array<i32>} : memref<256x64xbf16, #tpu.memory_space<vmem>>, vector<256x64xbf16>,
      %cst_14 = arith.constant dense<0.000000e+00> : vector<64xf32>
      %15 = vector.multi_reduction <add>, %12, %cst_14 [0] : vector<256x64xf32> to vector<64xf32>
      %16 = vector.shape_cast %15 : vector<64xf32> to vector<1x64xf32>
      %c0_15 = arith.constant 0 : index
      %c0_16 = arith.constant 0 : index
      %17 = vector.load %arg6[%c0_15, %c0_16] : memref<8x64xf32, #tpu.memory_space<vmem>>, vector<1x64xf32>
      tpu.vector_store %arg6[%c0_15, %c0_16], %16 {strides = array<i32>} : memref<8x64xf32, #tpu.memory_space<vmem>>, vector<1x64xf32>,
      %18 = arith.mulf %12, %12 : vector<256x64xf32>
      %cst_17 = arith.constant dense<0.000000e+00> : vector<64xf32>
      %19 = vector.multi_reduction <add>, %18, %cst_17 [0] : vector<256x64xf32> to vector<64xf32>
      %20 = vector.shape_cast %19 : vector<64xf32> to vector<1x64xf32>
      %c1 = arith.constant 1 : index
      %c0_18 = arith.constant 0 : index
      %21 = vector.load %arg6[%c1, %c0_18] : memref<8x64xf32, #tpu.memory_space<vmem>>, vector<1x64xf32>
      tpu.vector_store %arg6[%c1, %c0_18], %20 {strides = array<i32>} : memref<8x64xf32, #tpu.memory_space<vmem>>, vector<1x64xf32>,
    } else {
    }
    return
  }
  func.func @transform_0(%arg0: i32, %arg1: i32, %arg2: i32) -> (i32, i32) {
    %c0_i32 = arith.constant 0 : i32
    return %arg0, %arg2 : i32, i32
  }
  func.func @transform_1(%arg0: i32, %arg1: i32, %arg2: i32) -> (i32, i32) {
    %c0_i32 = arith.constant 0 : i32
    return %arg2, %arg1 : i32, i32
  }
  func.func @transform_2(%arg0: i32, %arg1: i32, %arg2: i32) -> (i32, i32) {
    %c0_i32 = arith.constant 0 : i32
    return %arg0, %arg1 : i32, i32
  }
  func.func @transform_3(%arg0: i32, %arg1: i32, %arg2: i32) -> (i32, i32) {
    %c0_i32 = arith.constant 0 : i32
    return %arg0, %arg1 : i32, i32
  }
}

</mosaic_0001>

<bundles_post_ra>
// kernel: tpu_custom_call.1
= control target key start
LH: loop header
LB: loop body
LE: loop exit
PB: predicated region body
PF: predicated region fallthrough
CT: control target
= control target key end

     0   :  { %9 = vsyncpa [#allocation4], 0  ;;  %s2182_s0 = inlined_call_operand.vmem [shape: bf16[512,49], index: 0, kind: input, shape index: {}]   ;;  %s2183_s1 = inlined_call_operand.vmem [shape: bf16[49,64], index: 1, kind: input, shape index: {}]   ;;  %s2184_s2 = inlined_call_operand.vmem [shape: bf16[512,64], index: 2, kind: output, shape index: {0}]   ;;  %s2185_s3 = inlined_call_operand.hbm [shape: f32[16,64], index: 3, kind: output, shape index: {1}]  }
   0x1   :  { %11 = vsyncpa [#allocation4 + $0x1], 0  ;;  %s1633_s12 = smov 0   ;;  %s1635_s13 = smov 0  }
   0x2   :  { %s1637_s14 = smov 0   ;;  %s1639_s15 = smov 0  }
   0x3   :  { %s1641_s16 = smov 0   ;;  %s1643_s17 = smov 0  }
   0x4 LB: > { %s1270_s18 = sadd.s32 4294967295, %s1608_s17   ;;  %s1271_s19 = sadd.s32 4294967294, %s1608_s17   ;;  %s1608_s17 = sphi %s1643_s17, %s17_s17   ;;  %s1604_s16 = sphi %s1641_s16, %s2193_s16   ;;  %s1600_s15 = sphi %s1639_s15, %s2192_s15   ;;  %s1596_s14 = sphi %s1637_s14, %s2191_s14   ;;  %s1592_s13 = sphi %s1635_s13, %s2190_s13   ;;  %s1588_s12 = sphi %s1633_s12, %s2189_s12  }
   0x5   : > { %s36_s20 = sadd.s32 1, %s1604_s16  ;;  %s129_s21 = sadd.s32 1, %s1596_s14 }
   0x6   : > { %p38_p0 = scmp.ge.s32.totalorder %s36_s20, 2  ;;  %p139_p1 = scmp.ne.s32.totalorder %s1596_s14, %s1592_s13 }
   0x7   : > { %p140_p2 = scmp.eq.s32.totalorder %s1270_s18, 1  ;;  %p145_p3 = scmp.ne.s32.totalorder %s1592_s13, %s1588_s12 }
   0x8   : > { %s2195_s20 = smov (%p38_p0, %s36_s20), 0  ;;  %p146_p5 = scmp.eq.s32.totalorder %s1271_s19, 1 }
   0x9   : > { %p1673_p4 = por %p140_p2, %p139_p1  ;;  %s124_s23 = ssub.s32 %s1604_s16, %s2195_s20 }
   0xa   : > { %p1275_p6 = scmp.ge.s32.totalorder %s1608_s17, 1  ;;  %p127_p7 = scmp.eq.s32.totalorder %s124_s23, 0 }
   0xb   : > { %p1680_p8 = por %p146_p5, %p145_p3  ;;  %p188_p9 = scmp.lt.s32.totalorder %s1608_s17, 3 }
   0xc   : > { %s1686_s25 = scalar_select %p127_p7, %s1596_s14, %s129_s21  }
   0xd   : > { %p189_p10 = pnand %p1275_p6, %p188_p9 }
   0xe   : > { %v1510_v0 = vld [vmem:[%s2183_s1] sm:$0xff] (!%p189_p10)   ;;  %v1511_v1 = vld [vmem:[%s2183_s1 + $0x8] sm:$0xff] (!%p189_p10)   ;;  %vm518_vm0 = vcmask (!%p189_p10), 1040384   ;;  %v1512_v2 = vld [vmem:[%s2183_s1 + $0x10] sm:$0xff] (!%p189_p10)   ;;  %s1277_s5 = sshll.u32 (!%p189_p10), %s1600_s15, 5  ;;  %vm263_vm1 = vcmask (!%p189_p10), 523264  }
   0xf   : > { %192 = sbr.rel (%p189_p10) target bundleno = 351 (0x15f), region = 28  ;;  %1405 = vmatprep.subr.bf16.mxu0 (!%p189_p10), %v1510_v0  ;;  %1445 = vmatprep.subr.bf16.mxu1 (!%p189_p10), %v1510_v0  ;;  %v1513_v3 = vld [vmem:[%s2183_s1 + $0x18] ss:$0 sps:$4 sm:$0x11] (!%p189_p10)   ;;  %p1703_p11 = scmp.lt.s32.totalorder (!%p189_p10), %s1277_s5, 63  ;;  %v1610_v4 = vmov (!%p189_p10), 0  }
  0x10   : > { %1406 = vmatpush3.bf16.msra.mxu0 (!%p189_p10), %v1510_v0  ;;  %1449 = vmatpush3.bf16.msra.mxu1 (!%p189_p10), %v1510_v0  ;;  %v520_v5 = vsel (!%p189_p10), %vm518_vm0, 65535, %v1610_v4  ;;  %v1611_v6 = vmov (!%p189_p10), 0.0   ;;  %vm469_vm2 = vcmask (!%p189_p10), 400384   ;;  %s228_s19 = sand.u32 (!%p189_p10), 1, %s1592_s13   ;;  %vm913_vm3 = vcmask (!%p189_p10), 519168   ;;  %s1350_s29 = sshll.u32 (!%p189_p10), %s1600_s15, 7 }
  0x11   : > { %1407 = vmatprep.subr.bf16.mxu0 (!%p189_p10), %v1511_v1  ;;  %1446 = vmatprep.subr.bf16.mxu1 (!%p189_p10), %v1511_v1  ;;  %266 = vst.msk [vmem:[#allocation2 + $0x10] sm:$0xff] (!%p189_p10), %vm263_vm1, %v1611_v6  ;;  %264 = vst.msk [vmem:[#allocation2] sm:$0xff] (!%p189_p10), %vm263_vm1, %v1611_v6  ;;  %v522_v7 = vand.u32 (!%p189_p10), %v1513_v3, %v520_v5  ;;  %s1276_s21 = sshll.u32 (!%p189_p10), %s228_s19, 3  ;;  %vm1015_vm4 = vcmask (!%p189_p10), 516096   ;;  %s2132_s6 = scalar_lea.hbm (!%p189_p10), %s2185_s3, %s1350_s29 }
  0x12   : > { %265 = vst.msk [vmem:[#allocation2 + $0x8] sm:$0xff] (!%p189_p10), %vm263_vm1, %v1611_v6  ;;  %267 = vst.msk [vmem:[#allocation2 + $0x18] sm:$0xff] (!%p189_p10), %vm263_vm1, %v1611_v6  ;;  %s1820_s23 = scalar_lea.vmem (!%p189_p10), [#allocation3], %s1276_s21  ;;  %s1128_s7 = scalar_lea.sflag (!%p189_p10), [#allocation4], %s228_s19 }
  0x13   : > { %268 = vst.msk [vmem:[#allocation2 + $0x20] sm:$0xff] (!%p189_p10), %vm263_vm1, %v1611_v6  ;;  %269 = vst.msk [vmem:[#allocation2 + $0x28] sm:$0xff] (!%p189_p10), %vm263_vm1, %v1611_v6  ;;  %s1146_s30 = sshll.u32 (!%p189_p10), %s1820_s23, 4  ;;  %s1612_s15 = smov (!%p189_p10), [#allocation3]   ;;  %s2134_s30 = int_to_ptr.vmem [resolvable:$true] %s1146_s30 }
  0x14   : > { %270 = vst.msk [vmem:[#allocation2 + $0x30] sm:$0xff] (!%p189_p10), %vm263_vm1, %v1611_v6  ;;  %271 = vst.msk [vmem:[#allocation2 + $0x38] sm:$0xff] (!%p189_p10), %vm263_vm1, %v1611_v6  ;;  %1408 = vmatpush3.bf16.msra.mxu0 (!%p189_p10), %v1511_v1  ;;  %1450 = vmatpush3.bf16.msra.mxu1 (!%p189_p10), %v1511_v1  ;;  %s1530_s8 = scalar_lea.vmem (!%p189_p10), %s2134_s30, 128 }
  0x15   : > { %272 = vst.msk [vmem:[#allocation2 + $0x40] sm:$0xff] (!%p189_p10), %vm263_vm1, %v1611_v6  ;;  %273 = vst.msk [vmem:[#allocation2 + $0x48] sm:$0xff] (!%p189_p10), %vm263_vm1, %v1611_v6  ;;  %1409 = vmatprep.subr.bf16.mxu0 (!%p189_p10), %v1512_v2  ;;  %1447 = vmatprep.subr.bf16.mxu1 (!%p189_p10), %v1512_v2  ;;  %p1531_p12 = scmp.ne.s32.totalorder (!%p189_p10), %s2134_s30, %s1530_s8 }
  0x16   : > { %274 = vst.msk [vmem:[#allocation2 + $0x50] sm:$0xff] %vm263_vm1, %v1611_v6  ;;  %275 = vst.msk [vmem:[#allocation2 + $0x58] sm:$0xff] %vm263_vm1, %v1611_v6  ;;  %s2197_s5 = smov (!%p1703_p11, %s1277_s5), 63 }
  0x17   : > { %276 = vst.msk [vmem:[#allocation2 + $0x60] sm:$0xff] %vm263_vm1, %v1611_v6  ;;  %277 = vst.msk [vmem:[#allocation2 + $0x68] sm:$0xff] %vm263_vm1, %v1611_v6  ;;  %s1278_s9 = sshll.u32 %s2197_s5, 2  ;;  %p1532_p13 = pnand %p1531_p12, %p1673_p4 }
  0x18   : > { %278 = vst.msk [vmem:[#allocation2 + $0x70] sm:$0xff] %vm263_vm1, %v1611_v6  ;;  %279 = vst.msk [vmem:[#allocation2 + $0x78] sm:$0xff] %vm263_vm1, %v1611_v6  ;;  %s1783_s18 = scalar_lea.vmem %s2182_s0, %s1278_s9  ;;  %1410 = vmatpush3.bf16.msra.mxu0 %v1512_v2  ;;  %1451 = vmatpush3.bf16.msra.mxu1 %v1512_v2  ;;  %v299_v24 = vld [vmem:[#allocation2 + $0x10] sm:$0xff]  ;;  %v297_v25 = vld [vmem:[#allocation2] sm:$0xff]  ;;  %s1838_s28 = scalar_lea.vmem %s2184_s2, %s1278_s9 }
  0x19   : > { %280 = vst.msk [vmem:[#allocation2 + $0x80] sm:$0xff] %vm263_vm1, %v1611_v6  ;;  %281 = vst.msk [vmem:[#allocation2 + $0x88] sm:$0xff] %vm263_vm1, %v1611_v6  ;;  %v1514_v8 = vld [vmem:[%s1783_s18] sm:$0xff]   ;;  %1411 = vmatprep.subr.bf16.mxu0 %v522_v7  ;;  %1448 = vmatprep.subr.bf16.mxu1 %v522_v7  ;;  %v1515_v9 = vld [vmem:[%s1783_s18 + $0x8] sm:$0xff]   ;;  %p1533_p0 = pneg %p1532_p13  ;;  %s1534_s9 = sshll.u32 %s1612_s15, 4  ;;  %s1535_s9 = int_to_ptr.vmem [resolvable:$false] %s1534_s9 }
  0x1a   : > { %282 = vst.msk [vmem:[#allocation2 + $0x90] sm:$0xff] %vm263_vm1, %v1611_v6  ;;  %283 = vst.msk [vmem:[#allocation2 + $0x98] sm:$0xff] %vm263_vm1, %v1611_v6  ;;  %1413 = vmatprep.mubr.msk.bf16.mxu0 %vm469_vm2, %v1514_v8  ;;  %v1516_v10 = vld [vmem:[%s1783_s18 + $0x10] sm:$0xff]   ;;  %v1522_v11 = vld [vmem:[%s1783_s18 + $0x40] sm:$0xff]   ;;  %s1536_s10 = scalar_lea.vmem %s1535_s9, 256  ;;  %p1537_p1 = scmp.lt.s32.totalorder %s2134_s30, %s1535_s9 }
  0x1b   : > { %284 = vst.msk [vmem:[#allocation2 + $0xa0] sm:$0xff] %vm263_vm1, %v1611_v6  ;;  %285 = vst.msk [vmem:[#allocation2 + $0xa8] sm:$0xff] %vm263_vm1, %v1611_v6  ;;  %v1523_v12 = vld [vmem:[%s1783_s18 + $0x48] sm:$0xff]   ;;  %1429 = vmatprep.mubr.msk.bf16.mxu1 %vm469_vm2, %v1522_v11  ;;  %v1524_v13 = vld [vmem:[%s1783_s18 + $0x50] sm:$0xff]   ;;  %p1538_p2 = scmp.lt.s32.totalorder %s1536_s10, %s1530_s8 }
  0x1c   : > { %286 = vst.msk [vmem:[#allocation2 + $0xb0] sm:$0xff] %vm263_vm1, %v1611_v6  ;;  %287 = vst.msk [vmem:[#allocation2 + $0xb8] sm:$0xff] %vm263_vm1, %v1611_v6  ;;  %1412 = vmatpush3.bf16.msra.mxu0 %v522_v7  ;;  %1452 = vmatpush3.bf16.msra.mxu1 %v522_v7  ;;  %v1517_v14 = vld [vmem:[%s1783_s18 + $0x18] sm:$0xff]   ;;  %v1518_v15 = vld [vmem:[%s1783_s18 + $0x20] sm:$0xff]  }
  0x1d   : > { %288 = vst.msk [vmem:[#allocation2 + $0xc0] sm:$0xff] %vm263_vm1, %v1611_v6  ;;  %289 = vst.msk [vmem:[#allocation2 + $0xc8] sm:$0xff] %vm263_vm1, %v1611_v6  ;;  %v1525_v16 = vld [vmem:[%s1783_s18 + $0x58] sm:$0xff]   ;;  %v1526_v17 = vld [vmem:[%s1783_s18 + $0x60] sm:$0xff]   ;;  %p1539_p3 = por %p1538_p2, %p1537_p1 }
  0x1e   : > { %290 = vst.msk [vmem:[#allocation2 + $0xd0] sm:$0xff] %vm263_vm1, %v1611_v6  ;;  %291 = vst.msk [vmem:[#allocation2 + $0xd8] sm:$0xff] %vm263_vm1, %v1611_v6  ;;  %v1519_v18 = vld [vmem:[%s1783_s18 + $0x28] sm:$0xff]   ;;  %v1520_v19 = vld [vmem:[%s1783_s18 + $0x30] sm:$0xff]  }
  0x1f   : > { %292 = vst.msk [vmem:[#allocation2 + $0xe0] sm:$0xff] %vm263_vm1, %v1611_v6  ;;  %293 = vst.msk [vmem:[#allocation2 + $0xe8] sm:$0xff] %vm263_vm1, %v1611_v6  ;;  %1414 = vmatmul.mubr.msk.bf16.vlgmr.msra.gmra.mrb[0].mxu0 %vm469_vm2, %v1515_v9  ;;  %1430 = vmatmul.mubr.msk.bf16.vlgmr.msra.gmra.mrb[0].mxu1 %vm469_vm2, %v1523_v12  ;;  %v1527_v20 = vld [vmem:[%s1783_s18 + $0x68] sm:$0xff]   ;;  %v1528_v21 = vld [vmem:[%s1783_s18 + $0x70] sm:$0xff]   ;;  %p1540_p5 = pnand %p1539_p3, %p1533_p0 }
  0x20   : > { %294 = vst.msk [vmem:[#allocation2 + $0xf0] sm:$0xff] %vm263_vm1, %v1611_v6  ;;  %295 = vst.msk [vmem:[#allocation2 + $0xf8] sm:$0xff] %vm263_vm1, %v1611_v6  ;;  %1417 = vmatprep.mubr.msk.bf16.mxu0 %vm469_vm2, %v1516_v10  ;;  %1433 = vmatprep.mubr.msk.bf16.mxu1 %vm469_vm2, %v1524_v13  ;;  %v1521_v22 = vld [vmem:[%s1783_s18 + $0x38] sm:$0xff]   ;;  %v298_v30 = vld [vmem:[#allocation2 + $0x8] sm:$0xff] }
  0x21   : > { %v1529_v23 = vld [vmem:[%s1783_s18 + $0x78] sm:$0xff]   ;;  %296 = vst.msk [vmem:[%s1820_s23] sm:$0xff] %vm263_vm1, %v1611_v6  ;;  %v315_v31 = vld [vmem:[#allocation2 + $0x90] sm:$0xff]  ;;  %v313_v34 = vld [vmem:[#allocation2 + $0x80] sm:$0xff] }
  0x22   : > { %v300_v27 = vld [vmem:[#allocation2 + $0x18] sm:$0xff]  ;;  %v314_v42 = vld [vmem:[#allocation2 + $0x88] sm:$0xff]  ;;  %v303_v45 = vld [vmem:[#allocation2 + $0x30] sm:$0xff] }
  0x23   : > { %v316_v38 = vld [vmem:[#allocation2 + $0x98] sm:$0xff]  ;;  %v301_v48 = vld [vmem:[#allocation2 + $0x20] sm:$0xff]  ;;  %v302_v54 = vld [vmem:[#allocation2 + $0x28] sm:$0xff] }
  0x24   : > { %v304_v51 = vld [vmem:[#allocation2 + $0x38] sm:$0xff]  ;;  %v307_v13 = vld [vmem:[#allocation2 + $0x50] sm:$0xff] }
  0x27   : > { %1418 = vmatmul.mubr.msk.bf16.gmra.mrb[4].mxu0 %vm469_vm2, %v1517_v14  ;;  %1434 = vmatmul.mubr.msk.bf16.gmra.mrb[4].mxu1 %vm469_vm2, %v1525_v16 }
  0x28   : > { %1421 = vmatprep.mubr.msk.bf16.mxu0 %vm469_vm2, %v1518_v15  ;;  %1437 = vmatprep.mubr.msk.bf16.mxu1 %vm469_vm2, %v1526_v17 }
  0x2f   : > { %1422 = vmatmul.mubr.msk.bf16.gmra.mrb[8].mxu0 %vm469_vm2, %v1519_v18  ;;  %1438 = vmatmul.mubr.msk.bf16.gmra.mrb[8].mxu1 %vm469_vm2, %v1527_v20  ;;  %v305_v18 = vld [vmem:[#allocation2 + $0x40] sm:$0xff] }
  0x30   : > { %1425 = vmatprep.mubr.msk.bf16.mxu0 %vm469_vm2, %v1520_v19  ;;  %1441 = vmatprep.mubr.msk.bf16.mxu1 %vm469_vm2, %v1528_v21 }
  0x37   : > { %1426 = vmatmul.mubr.msk.bf16.gmra.mrb[12].mxu0 %vm469_vm2, %v1521_v22  ;;  %1442 = vmatmul.mubr.msk.bf16.gmra.mrb[12].mxu1 %vm469_vm2, %v1529_v23 }
  0xf2   : > { %v1415_v26 = vpop.f32.mrb[0].mxu0  ;;  %v1431_v37 = vpop.f32.mrb[0].mxu1 }
  0xf3   : > { %v687_v28 = vadd.f32 %v1415_v26, %v299_v24  ;;  %v558_v29 = vpop.f32.mrb[1].mxu0  ;;  %v703_v40 = vadd.f32 %v1431_v37, %v315_v31  ;;  %v622_v41 = vpop.f32.mrb[1].mxu1 }
  0xf4   : > { %v685_v32 = vadd.f32 %v558_v29, %v297_v25  ;;  %v1416_v33 = vpop.f32.mrb[2].mxu0  ;;  %v701_v43 = vadd.f32 %v622_v41, %v313_v34  ;;  %v1432_v44 = vpop.f32.mrb[2].mxu1 }
  0xf5   : > { %720 = vst.msk [vmem:[#allocation2 + $0x10] sm:$0xff] %vm263_vm1, %v687_v28  ;;  %v688_v35 = vadd.f32 %v1416_v33, %v300_v27  ;;  %v561_v36 = vpop.f32.mrb[3].mxu0  ;;  %736 = vst.msk [vmem:[#allocation2 + $0x90] sm:$0xff] %vm263_vm1, %v703_v40  ;;  %v704_v46 = vadd.f32 %v1432_v44, %v316_v38  ;;  %v625_v47 = vpop.f32.mrb[3].mxu1 }
  0xf6   : > { %718 = vst.msk [vmem:[#allocation2] sm:$0xff] %vm263_vm1, %v685_v32  ;;  %v686_v39 = vadd.f32 %v561_v36, %v298_v30  ;;  %734 = vst.msk [vmem:[#allocation2 + $0x80] sm:$0xff] %vm263_vm1, %v701_v43  ;;  %v702_v49 = vadd.f32 %v625_v47, %v314_v42  ;;  %v308_v47 = vld [vmem:[#allocation2 + $0x58] sm:$0xff] }
  0xf7   : > { %721 = vst.msk [vmem:[#allocation2 + $0x18] sm:$0xff] %vm263_vm1, %v688_v35  ;;  %737 = vst.msk [vmem:[#allocation2 + $0x98] sm:$0xff] %vm263_vm1, %v704_v46 }
  0xf8   : > { %719 = vst.msk [vmem:[#allocation2 + $0x8] sm:$0xff] %vm263_vm1, %v686_v39  ;;  %735 = vst.msk [vmem:[#allocation2 + $0x88] sm:$0xff] %vm263_vm1, %v702_v49 }
  0xfa   : > { %v1419_v50 = vpop.f32.mrb[4].mxu0  ;;  %v1841_v62 = vpop.f32.mrb[4].mxu1 }
  0xfb   : > { %v691_v52 = vadd.f32 %v1419_v50, %v303_v45  ;;  %v574_v53 = vpop.f32.mrb[5].mxu0  ;;  %v1844_v3 = vpop.f32.mrb[5].mxu1 }
  0xfc   : > { %v755_v55 = vld [vmem:[#allocation2 + $0x10] sm:$0xff]  ;;  %v689_v56 = vadd.f32 %v574_v53, %v301_v48  ;;  %v1420_v57 = vpop.f32.mrb[6].mxu0  ;;  %v1851_v8 = vpop.f32.mrb[6].mxu1 }
  0xfd   : > { %v1355_v58 = vpack.c.bf16 %v755_v55, %v755_v55  ;;  %v753_v59 = vld [vmem:[#allocation2] sm:$0xff]  ;;  %724 = vst.msk [vmem:[#allocation2 + $0x30] sm:$0xff] %vm263_vm1, %v691_v52  ;;  %v692_v60 = vadd.f32 %v1420_v57, %v304_v51  ;;  %v577_v61 = vpop.f32.mrb[7].mxu0  ;;  %v1019_v4 = vmul.f32 %v755_v55, %v755_v55  ;;  %v1849_v7 = vld [vmem:[#allocation2 + $0x90] sm:$0xff]  ;;  %v1860_v15 = vpop.f32.mrb[7].mxu1  ;;  %v949_v21 = vsel %vm263_vm1, %v755_v55, 0.0 }
  0xfe   : > { %v1353_v63 = vpack.c.bf16 %v753_v59, %v753_v59  ;;  %v1017_v0 = vmul.f32 %v753_v59, %v753_v59  ;;  %v756_v1 = vld [vmem:[#allocation2 + $0x18] sm:$0xff]  ;;  %722 = vst.msk [vmem:[#allocation2 + $0x20] sm:$0xff] %vm263_vm1, %v689_v56  ;;  %v690_v2 = vadd.f32 %v577_v61, %v302_v54  ;;  %v946_v9 = vsel %vm263_vm1, %v753_v59, 0.0  ;;  %v1858_v14 = vld [vmem:[#allocation2 + $0x80] sm:$0xff]  ;;  %v306_v52 = vld [vmem:[#allocation2 + $0x48] sm:$0xff] }
  0xff   : > { %916 = vst.msk [vmem:[%s1838_s28 + $0x8] sm:$0xf] %vm913_vm3, %v1355_v58  ;;  %v1356_v5 = vpack.c.bf16 %v756_v1, %v756_v1  ;;  %v754_v6 = vld [vmem:[#allocation2 + $0x8] sm:$0xff]  ;;  %v1020_v16 = vmul.f32 %v756_v1, %v756_v1  ;;  %v1371_v19 = vpack.c.bf16 %v1849_v7, %v1849_v7  ;;  %v1866_v20 = vld [vmem:[#allocation2 + $0x98] sm:$0xff]  ;;  %v1369_v25 = vpack.c.bf16 %v1858_v14, %v1858_v14  ;;  %v311_v58 = vld [vmem:[#allocation2 + $0x70] sm:$0xff] }
 0x100   : > { %725 = vst.msk [vmem:[#allocation2 + $0x38] sm:$0xff] %vm263_vm1, %v692_v60  ;;  %v1354_v10 = vpack.c.bf16 %v754_v6, %v754_v6  ;;  %v947_v11 = vsel %vm263_vm1, %v754_v6, 0.0  ;;  %v1018_v12 = vmul.f32 %v754_v6, %v754_v6  ;;  %723 = vst.msk [vmem:[#allocation2 + $0x28] sm:$0xff] %vm263_vm1, %v690_v2  ;;  %v1049_v22 = vsel %vm263_vm1, %v1017_v0, 0.0  ;;  %v1900_v59 = vld [vmem:[#allocation2 + $0x88] sm:$0xff]  ;;  %v309_v2 = vld [vmem:[#allocation2 + $0x60] sm:$0xff] }
 0x101   : > { %914 = vst.msk [vmem:[%s1838_s28] sm:$0xf] %vm913_vm3, %v1353_v63  ;;  %917 = vst.msk [vmem:[%s1838_s28 + $0xc] sm:$0xf] %vm913_vm3, %v1356_v5  ;;  %v948_v17 = vadd.f32 %v947_v11, %v946_v9  ;;  %v1052_v30 = vsel %vm263_vm1, %v1019_v4, 0.0  ;;  %v1372_v34 = vpack.c.bf16 %v1866_v20, %v1866_v20  ;;  %v951_v35 = vsel %vm263_vm1, %v756_v1, 0.0 }
 0x102   : > { %915 = vst.msk [vmem:[%s1838_s28 + $0x4] sm:$0xf] %vm913_vm3, %v1354_v10  ;;  %v1050_v23 = vsel %vm263_vm1, %v1018_v12, 0.0  ;;  %v1423_v24 = vpop.f32.mrb[8].mxu0  ;;  %932 = vst.msk [vmem:[%s1838_s28 + $0x48] sm:$0xf] %vm913_vm3, %v1371_v19 }
 0x103   : > { %v950_v26 = vadd.f32 %v949_v21, %v948_v17  ;;  %v1051_v27 = vadd.f32 %v1050_v23, %v1049_v22  ;;  %v695_v28 = vadd.f32 %v1423_v24, %v307_v13  ;;  %v590_v29 = vpop.f32.mrb[9].mxu0  ;;  %930 = vst.msk [vmem:[%s1838_s28 + $0x40] sm:$0xf] %vm913_vm3, %v1369_v25  ;;  %v1054_v36 = vsel %vm263_vm1, %v1020_v16, 0.0  ;;  %v1885_v41 = vpop.f32.mrb[8].mxu1  ;;  %v312_v10 = vld [vmem:[#allocation2 + $0x78] sm:$0xff] }
 0x104   : > { %v759_v31 = vld [vmem:[#allocation2 + $0x30] sm:$0xff]  ;;  %v693_v32 = vadd.f32 %v590_v29, %v305_v18  ;;  %v1424_v33 = vpop.f32.mrb[10].mxu0  ;;  %933 = vst.msk [vmem:[%s1838_s28 + $0x4c] sm:$0xf] %vm913_vm3, %v1372_v34  ;;  %v1891_v48 = vpop.f32.mrb[9].mxu1  ;;  %v1370_v17 = vpack.c.bf16 %v1900_v59, %v1900_v59  ;;  %v310_v24 = vld [vmem:[#allocation2 + $0x68] sm:$0xff] }
 0x105   : > { %v1053_v37 = vadd.f32 %v1052_v30, %v1051_v27  ;;  %v1359_v38 = vpack.c.bf16 %v759_v31, %v759_v31  ;;  %v757_v39 = vld [vmem:[#allocation2 + $0x20] sm:$0xff]  ;;  %728 = vst.msk [vmem:[#allocation2 + $0x50] sm:$0xff] %vm263_vm1, %v695_v28  ;;  %v593_v40 = vpop.f32.mrb[11].mxu0  ;;  %v952_v43 = vadd.f32 %v951_v35, %v950_v26  ;;  %v1895_v53 = vpop.f32.mrb[10].mxu1  ;;  %v1023_v54 = vmul.f32 %v759_v31, %v759_v31 }
 0x106   : > { %v1357_v42 = vpack.c.bf16 %v757_v39, %v757_v39  ;;  %v953_v44 = vsel %vm263_vm1, %v757_v39, 0.0  ;;  %v1021_v45 = vmul.f32 %v757_v39, %v757_v39  ;;  %726 = vst.msk [vmem:[#allocation2 + $0x40] sm:$0xff] %vm263_vm1, %v693_v32  ;;  %v1902_v60 = vpop.f32.mrb[11].mxu1  ;;  %v696_v1 = vadd.f32 %v1424_v33, %v308_v47  ;;  %v318_v39 = vld [vmem:[#allocation2 + $0xa8] sm:$0xff] }
 0x107   : > { %v760_v46 = vld [vmem:[#allocation2 + $0x38] sm:$0xff]  ;;  %920 = vst.msk [vmem:[%s1838_s28 + $0x18] sm:$0xf] %vm913_vm3, %v1359_v38  ;;  %v1055_v49 = vadd.f32 %v1054_v36, %v1053_v37  ;;  %v758_v51 = vld [vmem:[#allocation2 + $0x28] sm:$0xff]  ;;  %v954_v55 = vadd.f32 %v953_v44, %v952_v43  ;;  %v957_v4 = vsel %vm263_vm1, %v759_v31, 0.0  ;;  %v694_v6 = vadd.f32 %v593_v40, %v306_v52  ;;  %v319_v31 = vld [vmem:[#allocation2 + $0xb0] sm:$0xff] }
 0x108   : > { %v1360_v50 = vpack.c.bf16 %v760_v46, %v760_v46  ;;  %918 = vst.msk [vmem:[%s1838_s28 + $0x10] sm:$0xf] %vm913_vm3, %v1357_v42  ;;  %v1056_v56 = vsel %vm263_vm1, %v1021_v45, 0.0  ;;  %v1358_v57 = vpack.c.bf16 %v758_v51, %v758_v51  ;;  %v955_v63 = vsel %vm263_vm1, %v758_v51, 0.0  ;;  %931 = vst.msk [vmem:[%s1838_s28 + $0x44] sm:$0xf] %vm913_vm3, %v1370_v17 }
 0x109   : > { %v1057_v61 = vadd.f32 %v1056_v56, %v1055_v49  ;;  %v1022_v0 = vmul.f32 %v758_v51, %v758_v51  ;;  %v956_v5 = vadd.f32 %v955_v63, %v954_v55  ;;  %v1024_v11 = vmul.f32 %v760_v46, %v760_v46  ;;  %729 = vst.msk [vmem:[#allocation2 + $0x58] sm:$0xff] %vm263_vm1, %v696_v1  ;;  %v317_v37 = vld [vmem:[#allocation2 + $0xa0] sm:$0xff]  ;;  %v320_v38 = vld [vmem:[#allocation2 + $0xb8] sm:$0xff]  ;;  %v323_v45 = vld [vmem:[#allocation2 + $0xd0] sm:$0xff] }
 0x10a   : > { %921 = vst.msk [vmem:[%s1838_s28 + $0x1c] sm:$0xf] %vm913_vm3, %v1360_v50  ;;  %919 = vst.msk [vmem:[%s1838_s28 + $0x14] sm:$0xf] %vm913_vm3, %v1358_v57  ;;  %v1427_v9 = vpop.f32.mrb[12].mxu0  ;;  %v1060_v25 = vsel %vm263_vm1, %v1023_v54, 0.0  ;;  %v707_v51 = vadd.f32 %v1841_v62, %v319_v31  ;;  %v705_v56 = vadd.f32 %v1844_v3, %v317_v37  ;;  %v708_v57 = vadd.f32 %v1851_v8, %v320_v38 }
 0x10b   : > { %v1058_v12 = vsel %vm263_vm1, %v1022_v0, 0.0  ;;  %v699_v13 = vadd.f32 %v1427_v9, %v311_v58  ;;  %v606_v16 = vpop.f32.mrb[13].mxu0  ;;  %v958_v18 = vadd.f32 %v957_v4, %v956_v5  ;;  %727 = vst.msk [vmem:[#allocation2 + $0x48] sm:$0xff] %vm263_vm1, %v694_v6  ;;  %v959_v26 = vsel %vm263_vm1, %v760_v46, 0.0  ;;  %v1924_v32 = vpop.f32.mrb[12].mxu1  ;;  %v321_v46 = vld [vmem:[#allocation2 + $0xc0] sm:$0xff] }
 0x10c   : > { %v1059_v19 = vadd.f32 %v1058_v12, %v1057_v61  ;;  %v1914_v21 = vld [vmem:[#allocation2 + $0x50] sm:$0xff]  ;;  %v697_v22 = vadd.f32 %v606_v16, %v309_v2  ;;  %v1428_v23 = vpop.f32.mrb[14].mxu0  ;;  %v1928_v40 = vpop.f32.mrb[13].mxu1  ;;  %v1062_v42 = vsel %vm263_vm1, %v1024_v11, 0.0  ;;  %v324_v52 = vld [vmem:[#allocation2 + $0xd8] sm:$0xff]  ;;  %v706_v58 = vadd.f32 %v1860_v15, %v318_v39  ;;  %v322_v61 = vld [vmem:[#allocation2 + $0xc8] sm:$0xff] }
 0x10d   : > { %v1363_v27 = vpack.c.bf16 %v1914_v21, %v1914_v21  ;;  %v761_v28 = vld [vmem:[#allocation2 + $0x40] sm:$0xff]  ;;  %732 = vst.msk [vmem:[#allocation2 + $0x70] sm:$0xff] %vm263_vm1, %v699_v13  ;;  %v700_v29 = vadd.f32 %v1428_v23, %v312_v10  ;;  %v609_v30 = vpop.f32.mrb[15].mxu0  ;;  %v960_v35 = vadd.f32 %v959_v26, %v958_v18  ;;  %v1934_v47 = vpop.f32.mrb[14].mxu1  ;;  %v1027_v63 = vmul.f32 %v1914_v21, %v1914_v21 }
 0x10e   : > { %v1061_v33 = vadd.f32 %v1060_v25, %v1059_v19  ;;  %v1361_v34 = vpack.c.bf16 %v761_v28, %v761_v28  ;;  %v961_v36 = vsel %vm263_vm1, %v761_v28, 0.0  ;;  %730 = vst.msk [vmem:[#allocation2 + $0x60] sm:$0xff] %vm263_vm1, %v697_v22  ;;  %v1025_v43 = vmul.f32 %v761_v28, %v761_v28  ;;  %v1939_v54 = vpop.f32.mrb[15].mxu1  ;;  %740 = vst.msk [vmem:[#allocation2 + $0xb0] sm:$0xff] %vm263_vm1, %v707_v51  ;;  %v325_v51 = vld [vmem:[#allocation2 + $0xe0] sm:$0xff] }
 0x10f   : > { %924 = vst.msk [vmem:[%s1838_s28 + $0x28] sm:$0xf] %vm913_vm3, %v1363_v27  ;;  %v698_v44 = vadd.f32 %v609_v30, %v310_v24  ;;  %v962_v49 = vadd.f32 %v961_v36, %v960_v35  ;;  %v711_v62 = vadd.f32 %v1885_v41, %v323_v45  ;;  %v709_v1 = vadd.f32 %v1891_v48, %v321_v46 }
 0x110   : > { %733 = vst.msk [vmem:[#allocation2 + $0x78] sm:$0xff] %vm263_vm1, %v700_v29  ;;  %v1063_v50 = vadd.f32 %v1062_v42, %v1061_v33  ;;  %v1064_v55 = vsel %vm263_vm1, %v1025_v43, 0.0  ;;  %v764_v0 = vld [vmem:[#allocation2 + $0x58] sm:$0xff]  ;;  %738 = vst.msk [vmem:[#allocation2 + $0xa0] sm:$0xff] %vm263_vm1, %v705_v56  ;;  %v712_v8 = vadd.f32 %v1895_v53, %v324_v52  ;;  %v710_v48 = vadd.f32 %v1902_v60, %v322_v61  ;;  %v327_v53 = vld [vmem:[#allocation2 + $0xf0] sm:$0xff] }
 0x111   : > { %922 = vst.msk [vmem:[%s1838_s28 + $0x20] sm:$0xf] %vm913_vm3, %v1361_v34  ;;  %v1364_v4 = vpack.c.bf16 %v764_v0, %v764_v0  ;;  %v1028_v5 = vmul.f32 %v764_v0, %v764_v0  ;;  %v965_v13 = vsel %vm263_vm1, %v1914_v21, 0.0  ;;  %v1068_v16 = vsel %vm263_vm1, %v1027_v63, 0.0  ;;  %v328_v61 = vld [vmem:[#allocation2 + $0xf8] sm:$0xff]  ;;  %v326_v63 = vld [vmem:[#allocation2 + $0xe8] sm:$0xff] }
 0x112   : > { %731 = vst.msk [vmem:[#allocation2 + $0x68] sm:$0xff] %vm263_vm1, %v698_v44  ;;  %v1065_v2 = vadd.f32 %v1064_v55, %v1063_v50  ;;  %v762_v3 = vld [vmem:[#allocation2 + $0x48] sm:$0xff]  ;;  %741 = vst.msk [vmem:[#allocation2 + $0xb8] sm:$0xff] %vm263_vm1, %v708_v57  ;;  %v967_v25 = vsel %vm263_vm1, %v764_v0, 0.0  ;;  %v715_v28 = vadd.f32 %v1924_v32, %v327_v53  ;;  %v977_v46 = vsel %vm263_vm1, %v1858_v14, 0.0 }
 0x113   : > { %739 = vst.msk [vmem:[#allocation2 + $0xa8] sm:$0xff] %vm263_vm1, %v706_v58  ;;  %v1362_v15 = vpack.c.bf16 %v762_v3, %v762_v3  ;;  %v963_v6 = vsel %vm263_vm1, %v762_v3, 0.0  ;;  %v1026_v41 = vmul.f32 %v762_v3, %v762_v3  ;;  %744 = vst.msk [vmem:[#allocation2 + $0xd0] sm:$0xff] %vm263_vm1, %v711_v62  ;;  %v1070_v21 = vsel %vm263_vm1, %v1028_v5, 0.0 }
 0x114   : > { %v767_v9 = vld [vmem:[#allocation2 + $0x70] sm:$0xff]  ;;  %742 = vst.msk [vmem:[#allocation2 + $0xc0] sm:$0xff] %vm263_vm1, %v709_v1  ;;  %v964_v10 = vadd.f32 %v963_v6, %v962_v49  ;;  %745 = vst.msk [vmem:[#allocation2 + $0xd8] sm:$0xff] %vm263_vm1, %v712_v8  ;;  %v1033_v56 = vmul.f32 %v1858_v14, %v1858_v14 }
 0x115   : > { %925 = vst.msk [vmem:[%s1838_s28 + $0x2c] sm:$0xf] %vm913_vm3, %v1364_v4  ;;  %v1367_v11 = vpack.c.bf16 %v767_v9, %v767_v9  ;;  %v765_v12 = vld [vmem:[#allocation2 + $0x60] sm:$0xff]  ;;  %923 = vst.msk [vmem:[%s1838_s28 + $0x24] sm:$0xf] %vm913_vm3, %v1362_v15  ;;  %v1066_v17 = vsel %vm263_vm1, %v1026_v41, 0.0  ;;  %v1031_v30 = vmul.f32 %v767_v9, %v767_v9  ;;  %v713_v41 = vadd.f32 %v1928_v40, %v325_v51 }
 0x116   : > { %v1365_v60 = vpack.c.bf16 %v765_v12, %v765_v12  ;;  %743 = vst.msk [vmem:[#allocation2 + $0xc8] sm:$0xff] %vm263_vm1, %v710_v48  ;;  %v966_v19 = vadd.f32 %v965_v13, %v964_v10  ;;  %v1067_v22 = vadd.f32 %v1066_v17, %v1065_v2  ;;  %v1029_v23 = vmul.f32 %v765_v12, %v765_v12  ;;  %v1979_v34 = vld [vmem:[#allocation2 + $0xb0] sm:$0xff] }
 0x117   : > { %v768_v18 = vld [vmem:[#allocation2 + $0x78] sm:$0xff]  ;;  %928 = vst.msk [vmem:[%s1838_s28 + $0x38] sm:$0xf] %vm913_vm3, %v1367_v11  ;;  %v969_v26 = vsel %vm263_vm1, %v765_v12, 0.0  ;;  %v1375_v38 = vpack.c.bf16 %v1979_v34, %v1979_v34  ;;  %v1985_v39 = vld [vmem:[#allocation2 + $0xa0] sm:$0xff]  ;;  %v973_v0 = vsel %vm263_vm1, %v767_v9, 0.0  ;;  %v716_v9 = vadd.f32 %v1934_v47, %v328_v61 }
 0x118   : > { %v1368_v24 = vpack.c.bf16 %v768_v18, %v768_v18  ;;  %926 = vst.msk [vmem:[%s1838_s28 + $0x30] sm:$0xf] %vm913_vm3, %v1365_v60  ;;  %v1069_v29 = vadd.f32 %v1068_v16, %v1067_v22  ;;  %v968_v31 = vadd.f32 %v967_v25, %v966_v19  ;;  %v1072_v35 = vsel %vm263_vm1, %v1029_v23, 0.0 }
 0x119   : > { %v766_v27 = vld [vmem:[#allocation2 + $0x68] sm:$0xff]  ;;  %v1987_v32 = vld [vmem:[#allocation2 + $0xb8] sm:$0xff]  ;;  %748 = vst.msk [vmem:[#allocation2 + $0xf0] sm:$0xff] %vm263_vm1, %v715_v28  ;;  %v1373_v49 = vpack.c.bf16 %v1985_v39, %v1985_v39  ;;  %v1076_v62 = vsel %vm263_vm1, %v1031_v30, 0.0  ;;  %v1032_v1 = vmul.f32 %v768_v18, %v768_v18  ;;  %v975_v6 = vsel %vm263_vm1, %v768_v18, 0.0  ;;  %746 = vst.msk [vmem:[#allocation2 + $0xe0] sm:$0xff] %vm263_vm1, %v713_v41 }
 0x11a   : > { %929 = vst.msk [vmem:[%s1838_s28 + $0x3c] sm:$0xf] %vm913_vm3, %v1368_v24  ;;  %v1366_v33 = vpack.c.bf16 %v766_v27, %v766_v27  ;;  %v971_v36 = vsel %vm263_vm1, %v766_v27, 0.0  ;;  %v1030_v37 = vmul.f32 %v766_v27, %v766_v27  ;;  %v970_v42 = vadd.f32 %v969_v26, %v968_v31  ;;  %v1992_v44 = vld [vmem:[#allocation2 + $0xa8] sm:$0xff]  ;;  %936 = vst.msk [vmem:[%s1838_s28 + $0x58] sm:$0xf] %vm913_vm3, %v1375_v38 }
 0x11b   : > { %v1071_v43 = vadd.f32 %v1070_v21, %v1069_v29  ;;  %v2001_v50 = vld [vmem:[#allocation2 + $0xc0] sm:$0xff]  ;;  %v1376_v57 = vpack.c.bf16 %v1987_v32, %v1987_v32  ;;  %934 = vst.msk [vmem:[%s1838_s28 + $0x50] sm:$0xf] %vm913_vm3, %v1373_v49  ;;  %v1374_v2 = vpack.c.bf16 %v1992_v44, %v1992_v44  ;;  %v2015_v14 = vld [vmem:[#allocation2 + $0xd0] sm:$0xff]  ;;  %v2017_v4 = vld [vmem:[#allocation2 + $0xd8] sm:$0xff]  ;;  %v714_v48 = vadd.f32 %v1939_v54, %v326_v63 }
 0x11c   : > { %927 = vst.msk [vmem:[%s1838_s28 + $0x34] sm:$0xf] %vm913_vm3, %v1366_v33  ;;  %v1074_v45 = vsel %vm263_vm1, %v1030_v37, 0.0  ;;  %v972_v55 = vadd.f32 %v971_v36, %v970_v42  ;;  %v1377_v8 = vpack.c.bf16 %v2001_v50, %v2001_v50  ;;  %v1379_v53 = vpack.c.bf16 %v2015_v14, %v2015_v14 }
 0x11d   : > { %v1073_v52 = vadd.f32 %v1072_v35, %v1071_v43  ;;  %v2007_v58 = vld [vmem:[#allocation2 + $0xc8] sm:$0xff]  ;;  %937 = vst.msk [vmem:[%s1838_s28 + $0x5c] sm:$0xf] %vm913_vm3, %v1376_v57  ;;  %935 = vst.msk [vmem:[%s1838_s28 + $0x54] sm:$0xf] %vm913_vm3, %v1374_v2  ;;  %v1380_v40 = vpack.c.bf16 %v2017_v4, %v2017_v4  ;;  %v1078_v47 = vsel %vm263_vm1, %v1032_v1, 0.0  ;;  %v1034_v13 = vmul.f32 %v1900_v59, %v1900_v59 }
 0x11e   : > { %v974_v5 = vadd.f32 %v973_v0, %v972_v55  ;;  %v1378_v15 = vpack.c.bf16 %v2007_v58, %v2007_v58  ;;  %938 = vst.msk [vmem:[%s1838_s28 + $0x60] sm:$0xf] %vm913_vm3, %v1377_v8  ;;  %v1080_v54 = vsel %vm263_vm1, %v1033_v56, 0.0  ;;  %940 = vst.msk [vmem:[%s1838_s28 + $0x68] sm:$0xf] %vm913_vm3, %v1379_v53  ;;  %v1035_v18 = vmul.f32 %v1849_v7, %v1849_v7 }
 0x11f   : > { %v1075_v3 = vadd.f32 %v1074_v45, %v1073_v52  ;;  %749 = vst.msk [vmem:[#allocation2 + $0xf8] sm:$0xff] %vm263_vm1, %v716_v9  ;;  %747 = vst.msk [vmem:[#allocation2 + $0xe8] sm:$0xff] %vm263_vm1, %v714_v48  ;;  %v979_v19 = vsel %vm263_vm1, %v1900_v59, 0.0  ;;  %v1036_v23 = vmul.f32 %v1866_v20, %v1866_v20  ;;  %v1037_v25 = vmul.f32 %v1985_v39, %v1985_v39 }
 0x120   : > { %v976_v11 = vadd.f32 %v975_v6, %v974_v5  ;;  %939 = vst.msk [vmem:[%s1838_s28 + $0x64] sm:$0xf] %vm913_vm3, %v1378_v15  ;;  %v2035_v12 = vld [vmem:[#allocation2 + $0xf0] sm:$0xff]  ;;  %941 = vst.msk [vmem:[%s1838_s28 + $0x6c] sm:$0xf] %vm913_vm3, %v1380_v40  ;;  %v981_v21 = vsel %vm263_vm1, %v1849_v7, 0.0  ;;  %v1038_v42 = vmul.f32 %v1992_v44, %v1992_v44  ;;  %v1039_v49 = vmul.f32 %v1979_v34, %v1979_v34 }
 0x121   : > { %v1077_v10 = vadd.f32 %v1076_v62, %v1075_v3  ;;  %v1383_v16 = vpack.c.bf16 %v2035_v12, %v2035_v12  ;;  %v1082_v26 = vsel %vm263_vm1, %v1034_v13, 0.0  ;;  %v1084_v29 = vsel %vm263_vm1, %v1035_v18, 0.0  ;;  %v781_v36 = vld [vmem:[#allocation2 + $0xe0] sm:$0xff] }
 0x122   : > { %v978_v17 = vadd.f32 %v977_v46, %v976_v11  ;;  %v983_v59 = vsel %vm263_vm1, %v1866_v20, 0.0  ;;  %v985_v30 = vsel %vm263_vm1, %v1985_v39, 0.0  ;;  %v1086_v31 = vsel %vm263_vm1, %v1036_v23, 0.0 }
 0x123   : > { %v1079_v60 = vadd.f32 %v1078_v47, %v1077_v10  ;;  %944 = vst.msk [vmem:[%s1838_s28 + $0x78] sm:$0xf] %vm913_vm3, %v1383_v16  ;;  %v1088_v7 = vsel %vm263_vm1, %v1037_v25, 0.0  ;;  %v1381_v43 = vpack.c.bf16 %v781_v36, %v781_v36  ;;  %v987_v51 = vsel %vm263_vm1, %v1992_v44, 0.0 }
 0x124   : > { %v980_v24 = vadd.f32 %v979_v19, %v978_v17  ;;  %v989_v56 = vsel %vm263_vm1, %v1979_v34, 0.0  ;;  %v1040_v57 = vmul.f32 %v1987_v32, %v1987_v32  ;;  %v1090_v61 = vsel %vm263_vm1, %v1038_v42, 0.0 }
 0x125   : > { %v1081_v22 = vadd.f32 %v1080_v54, %v1079_v60  ;;  %942 = vst.msk [vmem:[%s1838_s28 + $0x70] sm:$0xf] %vm913_vm3, %v1381_v43  ;;  %v1041_v63 = vmul.f32 %v2001_v50, %v2001_v50  ;;  %v991_v62 = vsel %vm263_vm1, %v1987_v32, 0.0  ;;  %v993_v1 = vsel %vm263_vm1, %v2001_v50, 0.0 }
 0x126   : > { %v982_v27 = vadd.f32 %v981_v21, %v980_v24  ;;  %v782_v37 = vld [vmem:[#allocation2 + $0xe8] sm:$0xff]  ;;  %v784_v38 = vld [vmem:[#allocation2 + $0xf8] sm:$0xff]  ;;  %v1092_v2 = vsel %vm263_vm1, %v1039_v49, 0.0  ;;  %v1042_v3 = vmul.f32 %v2007_v58, %v2007_v58  ;;  %v1094_v8 = vsel %vm263_vm1, %v1040_v57, 0.0 }
 0x127   : > { %v1083_v28 = vadd.f32 %v1082_v26, %v1081_v22  ;;  %v1382_v20 = vpack.c.bf16 %v782_v37, %v782_v37  ;;  %v1384_v45 = vpack.c.bf16 %v784_v38, %v784_v38  ;;  %v1096_v15 = vsel %vm263_vm1, %v1041_v63, 0.0 }
 0x128   : > { %v984_v35 = vadd.f32 %v983_v59, %v982_v27  ;;  %v995_v9 = vsel %vm263_vm1, %v2007_v58, 0.0  ;;  %v1043_v32 = vmul.f32 %v2015_v14, %v2015_v14  ;;  %v997_v10 = vsel %vm263_vm1, %v2015_v14, 0.0 }
 0x129   : > { %v1085_v33 = vadd.f32 %v1084_v29, %v1083_v28  ;;  %943 = vst.msk [vmem:[%s1838_s28 + $0x74] sm:$0xf] %vm913_vm3, %v1382_v20  ;;  %945 = vst.msk [vmem:[%s1838_s28 + $0x7c] sm:$0xf] %vm913_vm3, %v1384_v45  ;;  %v1044_v11 = vmul.f32 %v2017_v4, %v2017_v4  ;;  %v1045_v53 = vmul.f32 %v781_v36, %v781_v36  ;;  %v1098_v40 = vsel %vm263_vm1, %v1042_v3, 0.0 }
 0x12a   : > { %v986_v46 = vadd.f32 %v985_v30, %v984_v35  ;;  %v999_v13 = vsel %vm263_vm1, %v2017_v4, 0.0  ;;  %v1001_v58 = vsel %vm263_vm1, %v781_v36, 0.0  ;;  %v1100_v16 = vsel %vm263_vm1, %v1043_v32, 0.0 }
 0x12b   : > { %v1087_v39 = vadd.f32 %v1086_v31, %v1085_v33  ;;  %v1046_v18 = vmul.f32 %v782_v37, %v782_v37  ;;  %v1102_v14 = vsel %vm263_vm1, %v1044_v11, 0.0  ;;  %v1104_v19 = vsel %vm263_vm1, %v1045_v53, 0.0 }
 0x12c   : > { %v988_v55 = vadd.f32 %v987_v51, %v986_v46  ;;  %v1003_v24 = vsel %vm263_vm1, %v782_v37, 0.0  ;;  %v1047_v25 = vmul.f32 %v2035_v12, %v2035_v12  ;;  %v1005_v26 = vsel %vm263_vm1, %v2035_v12, 0.0 }
 0x12d   : > { %v1089_v52 = vadd.f32 %v1088_v7, %v1087_v39  ;;  %v1048_v27 = vmul.f32 %v784_v38, %v784_v38  ;;  %v1106_v28 = vsel %vm263_vm1, %v1046_v18, 0.0  ;;  %v1007_v30 = vsel %vm263_vm1, %v784_v38, 0.0 }
 0x12e   : > { %v990_v44 = vadd.f32 %v989_v56, %v988_v55  ;;  %v1108_v31 = vsel %vm263_vm1, %v1047_v25, 0.0 }
 0x12f   : > { %v1091_v0 = vadd.f32 %v1090_v61, %v1089_v52  ;;  %v1110_v7 = vsel %vm263_vm1, %v1048_v27, 0.0 }
 0x130   : > { %v992_v5 = vadd.f32 %v991_v62, %v990_v44 }
 0x131   : > { %v1093_v34 = vadd.f32 %v1092_v2, %v1091_v0 }
 0x132   : > { %v994_v6 = vadd.f32 %v993_v1, %v992_v5 }
 0x133   : > { %v1095_v41 = vadd.f32 %v1094_v8, %v1093_v34 }
 0x134   : > { %v996_v50 = vadd.f32 %v995_v9, %v994_v6 }
 0x135   : > { %v1097_v48 = vadd.f32 %v1096_v15, %v1095_v41 }
 0x136   : > { %v998_v47 = vadd.f32 %v997_v10, %v996_v50 }
 0x137   : > { %v1099_v54 = vadd.f32 %v1098_v40, %v1097_v48 }
 0x138   : > { %v1000_v17 = vadd.f32 %v999_v13, %v998_v47 }
 0x139   : > { %v1101_v60 = vadd.f32 %v1100_v16, %v1099_v54 }
 0x13a   : > { %v1002_v22 = vadd.f32 %v1001_v58, %v1000_v17 }
 0x13b   : > { %v1103_v23 = vadd.f32 %v1102_v14, %v1101_v60 }
 0x13c   : > { %v1004_v21 = vadd.f32 %v1003_v24, %v1002_v22 }
 0x13d   : > { %v1105_v4 = vadd.f32 %v1104_v19, %v1103_v23 }
 0x13e   : > { %v1006_v29 = vadd.f32 %v1005_v26, %v1004_v21 }
 0x13f   : > { %v1107_v59 = vadd.f32 %v1106_v28, %v1105_v4 }
 0x140   : > { %v1008_v33 = vadd.f32 %v1007_v30, %v1006_v29 }
 0x141   : > { %v1109_v35 = vadd.f32 %v1108_v31, %v1107_v59 }
 0x142   : > { %v1009_v36 = vrot.slane %v1008_v33, 4 }
 0x143   : > { %v1111_v37 = vadd.f32 %v1110_v7, %v1109_v35 }
 0x144   : > { %v1010_v42 = vadd.f32 %v1009_v36, %v1008_v33 }
 0x145   : > { %v1112_v12 = vrot.slane %v1111_v37, 4 }
 0x146   : > { %v1011_v43 = vrot.slane %v1010_v42, 2 }
 0x147   : > { %v1113_v20 = vadd.f32 %v1112_v12, %v1111_v37 }
 0x148   : > { %v1012_v45 = vadd.f32 %v1011_v43, %v1010_v42 }
 0x149   : > { %v1114_v46 = vrot.slane %v1113_v20, 2 }
 0x14a   : > { %v1013_v38 = vrot.slane %v1012_v45, 1 }
 0x14b   : > { %v1115_v39 = vadd.f32 %v1114_v46, %v1113_v20 }
 0x14c   : > { %v1014_v49 = vadd.f32 %v1013_v38, %v1012_v45 }
 0x14d   : > { %v1116_v51 = vrot.slane %v1115_v39, 1 }
 0x14e   : > { %1016 = vst.msk [vmem:[%s1820_s23] sm:$0x1] %vm1015_vm4, %v1014_v49 }
 0x14f   : > { %v1117_v52 = vadd.f32 %v1116_v51, %v1115_v39 }
 0x151   : > { %1118 = vst.msk [vmem:[%s1820_s23 + $0x1] sm:$0x1] %vm1015_vm4, %v1117_v52 }
 0x152   : > { %1543 = shalt.err (!%p1540_p5)
}
 0x153   : > { %s1544_s11 = scalar_lea.hbm %s2132_s6, 128  ;;  %s1548_s21 = scalar_lea.hbm %s2185_s3, 256 }
 0x154   : > { %p1545_p6 = scmp.ne.s32.totalorder %s2132_s6, %s1544_s11  ;;  %p1549_p10 = scmp.lt.u32.totalorder %s2132_s6, %s2185_s3 }
 0x155   : > { %p1550_p11 = scmp.lt.u32.totalorder %s1548_s21, %s1544_s11  ;;  %p1552_p13 = scmp.lt.u32.totalorder %s1544_s11, %s2132_s6 }
 0x156   : > { %p1546_p7 = pnand %p1545_p6, %p1673_p4 }
 0x157   : > { %p1551_p12 = por %p1550_p11, %p1549_p10 }
 0x158   : > { %p1547_p9 = pneg %p1546_p7 }
 0x159   : > { %p1553_p0 = por %p1552_p13, %p1551_p12 }
 0x15b   : > { %p1554_p1 = pnand %p1553_p0, %p1547_p9 }
 0x15d   : > { %1557 = shalt.err (!%p1554_p1)
}
 0x15e   : > { %1453 = dma.vmem_to_hbm [thread:$0]  (%p1673_p4), %s2134_s30, 128, %s2132_s6, %s1128_s7  }
 0x15f PF: > { %p1459_p2 = scmp.ge.s32.totalorder %s1608_s17, 2  ;;  %s1169_s27 = sand.u32 1, %s1588_s12  }
 0x160   : > { %s1170_s28 = scalar_lea.sflag [#allocation4], %s1169_s27 }
 0x161   : > { %p1456_p3 = pnand %p1459_p2, %p1680_p8 }
 0x163   : > { %1583 = dma.done.wait (!%p1456_p3), %s1170_s28, 128  }
 0x164   : > { %1585 = vsyncadd (!%p1456_p3), %s1170_s28, 4294967168  ;;  %s17_s17 = sadd.s32 1, %s1608_s17   ;;  %s2189_s12 = smov %s1592_s13 }
 0x165   : > { %p14_p5 = scmp.ge.s32.totalorder %s17_s17, 4   ;;  %s2190_s13 = smov %s1596_s14 }
 0x166   : > { %s2191_s14 = smov %s1686_s25  ;;  %s2192_s15 = smov %s1604_s16 }
 0x167   : > { %s2193_s16 = smov %s2195_s20  ;;  %16 = sbr.rel (!%p14_p5) target bundleno = 4 (0x4), region = 86 }
 0x16e   :  { %1175 = vsyncpa [#allocation4], 1 }
 0x16f   :  { %1177 = vsyncpa [#allocation4 + $0x1], 1 }

</bundles_post_ra>
